<compile_context>
chip_gen: v5e
topology: v5e:2x2
jax: 0.10.0
libtpu: 0.0.40
codegen_flags: <defaults>
</compile_context>

<pallas_src>
import jax
import jax.numpy as jnp
from jax.experimental import pallas as pl
from jax.experimental.pallas import tpu as pltpu

IN_FEATURES = 11 * 2 * 10 + 1   # 221
OUT_FEATURES = 2


def _round_up(x, m):
    return ((x + m - 1) // m) * m


def _pick_tile_and_vmem_limit():
    """Generation-dispatched (batch_tile, vmem_limit_bytes) from real VMEM size.

    Uses lane-padded footprints: per step (double-buffered) = tb * 3 KiB (f32 x).
    Falls back to the v7x-safe (smallest-VMEM) configuration if the hardware
    query is unavailable, so the kernel always runs.
    """
    vmem_bytes = 64 << 20   # v7x per-TC physical VMEM = smallest in the fleet
    try:
        info = pltpu.get_tpu_info()
        vmem_bytes = int(getattr(info, "vmem_capacity_bytes", vmem_bytes))
    except Exception:
        pass
    if vmem_bytes >= (128 << 20):
        # v5e / v6e: x 24 MiB x2 + out 12 MiB x2 = 72 MiB double-buffered.
        return 24576, 80 << 20
    # v7x (64 MiB/TC): x 16 MiB x2 + out 8 MiB x2 = 48 MiB double-buffered.
    return 16384, 56 << 20


def _linear_kernel(x_ref, w_ref, o_ref):
    # x_ref: (tb, 221) native dtype; w_ref: (221, 2) f32; o_ref: (tb, 2) f32.
    x = x_ref[...]
    if jnp.issubdtype(x_ref.dtype, jnp.floating) and x_ref.dtype != jnp.float32:
        # Cast the tiny resident weight down (a few vregs) instead of upcasting
        # the whole x tile; native low-precision MXU matmul, f32 accumulate.
        w = w_ref[...].astype(x_ref.dtype)
        o_ref[...] = jnp.dot(x, w, preferred_element_type=jnp.float32)
    else:
        # f32 inputs (exact module semantics) and integer inputs (x.float()).
        o_ref[...] = jnp.dot(x.astype(jnp.float32), w_ref[...],
                             preferred_element_type=jnp.float32)


def blackjack_net5b_forward(x, w_t, *, tb=None):
    """Forward of BlackJackNet5b.

    x:   (B, 221) float (prefer bf16 end-to-end: the op is x-read bound) or int.
    w_t: (221, 2) f32 weight, stored transposed (in_features, out_features).
    Returns (B, 2) f32 policy logits.
    """
    B = x.shape[0]
    assert x.shape[1] == IN_FEATURES
    auto_tb, vmem_limit = _pick_tile_and_vmem_limit()
    if tb is None:
        tb = auto_tb
    # Batch tile: multiple of 8 (f32 sublane), never larger than needed.
    tb = min(tb, _round_up(max(B, 1), 8))
    grid = (pl.cdiv(B, tb),)

    itemsize = jnp.dtype(x.dtype).itemsize
    cost = pl.CostEstimate(
        flops=2 * B * IN_FEATURES * OUT_FEATURES,
        bytes_accessed=(B * IN_FEATURES * itemsize          # read x
                        + B * OUT_FEATURES * 4              # write policy
                        + IN_FEATURES * OUT_FEATURES * 4),  # read weight
        transcendentals=0,
    )

    return pl.pallas_call(
        _linear_kernel,
        out_shape=jax.ShapeDtypeStruct((B, OUT_FEATURES), jnp.float32),
        grid_spec=pltpu.PrefetchScalarGridSpec(
            num_scalar_prefetch=0,
            grid=grid,
            in_specs=[
                # x: tiled along batch; full 221-wide last dim (== array dim).
                pl.BlockSpec((tb, IN_FEATURES), lambda i: (i, 0)),
                # weight: constant block -> stays resident in VMEM.
                pl.BlockSpec((IN_FEATURES, OUT_FEATURES), lambda i: (0, 0)),
            ],
            out_specs=pl.BlockSpec((tb, OUT_FEATURES), lambda i: (i, 0)),
        ),
        compiler_params=pltpu.CompilerParams(
            # Independent batch tiles -> shard across v7x's 2 TensorCores.
            dimension_semantics=("parallel",),
            # Explicit limit sized from real lane-padded footprints (see header).
            vmem_limit_bytes=vmem_limit,
        ),
        cost_estimate=cost,
    )(x, w_t)


def init_params():
    # Matches nn.init.constant_(m.weight, 0) in the module's __init__.
    # Weight stored transposed: (in_features, out_features).
    return jnp.zeros((IN_FEATURES, OUT_FEATURES), dtype=jnp.float32)


if __name__ == "__main__":
    key = jax.random.PRNGKey(0)
    kx, kw, kx2 = jax.random.split(key, 3)

    # --- test 1: ragged batch, multiple grid steps, random (non-zero) weight ---
    batch = 40                    # with tb=16 -> grid of 3, ragged last tile
    x = jax.random.normal(kx, (batch, IN_FEATURES), dtype=jnp.float32)
    w_t = jax.random.normal(kw, (IN_FEATURES, OUT_FEATURES), dtype=jnp.float32)

    policy = blackjack_net5b_forward(x, w_t, tb=16)
    jax.block_until_ready(policy)
    ref = jnp.dot(x, w_t, preferred_element_type=jnp.float32)
    assert policy.shape == (batch, OUT_FEATURES)
    assert jnp.allclose(policy, ref, atol=1e-2, rtol=1e-2), "mismatch vs reference (f32)"

    # --- test 2: native bf16 input -> in-kernel bf16 MXU matmul, f32 accumulate ---
    x_bf16 = jax.random.normal(kx2, (batch, IN_FEATURES), dtype=jnp.bfloat16)
    policy_bf16 = blackjack_net5b_forward(x_bf16, w_t, tb=16)
    jax.block_until_ready(policy_bf16)
    # Bit-comparable reference: same bf16 x bf16 matmul with f32 accumulation.
    ref_bf16 = jnp.dot(x_bf16, w_t.astype(jnp.bfloat16),
                       preferred_element_type=jnp.float32)
    assert jnp.allclose(policy_bf16, ref_bf16, atol=1e-2, rtol=1e-2), \
        "mismatch vs reference (bf16 matmul)"
    # Semantic fidelity vs the module's f32 path (loose: bf16 rounding of x/w).
    ref_f32 = jnp.dot(x_bf16.astype(jnp.float32), w_t,
                      preferred_element_type=jnp.float32)
    assert jnp.allclose(policy_bf16, ref_f32, atol=2e-1, rtol=5e-2), \
        "bf16 path drifted too far from f32 semantics"

    # --- test 3: module's actual zero-init weight, small batch, auto tile ---
    x_small = jax.random.normal(kx, (4, IN_FEATURES), dtype=jnp.float32)
    policy_zero = blackjack_net5b_forward(x_small, init_params())
    jax.block_until_ready(policy_zero)
    assert policy_zero.shape == (4, OUT_FEATURES)
    assert jnp.allclose(policy_zero, jnp.zeros((4, OUT_FEATURES), jnp.float32)), \
        "zero-init weight must give zero policy"

    print("KERNEL_OK")
</pallas_src>

<mosaic_0001>
module attributes {stable_mosaic.version = 11 : i64} {
  func.func @_linear_kernel(%arg0: i32, %arg1: memref<16x221xf32, #tpu.memory_space<vmem>>, %arg2: memref<221x2xf32, #tpu.memory_space<vmem>>, %arg3: memref<16x2xf32, #tpu.memory_space<vmem>>) attributes {dimension_semantics = [#tpu.dimension_semantics<parallel>], iteration_bounds = array<i64: 3>, scalar_prefetch = 0 : i64, scratch_operands = 0 : i64, tpu.core_type = #tpu.core_type<tc>, window_params = [{transform_indices = @transform_0, window_bounds = array<i64: 16, 221>}, {pipeline_mode = #tpu.pipeline_mode<synchronous>, transform_indices = @transform_1, window_bounds = array<i64: 221, 2>}, {transform_indices = @transform_2, window_bounds = array<i64: 16, 2>}]} {
    %c0 = arith.constant 0 : index
    %c0_0 = arith.constant 0 : index
    %0 = vector.load %arg1[%c0, %c0_0] : memref<16x221xf32, #tpu.memory_space<vmem>>, vector<16x221xf32>
    %c0_1 = arith.constant 0 : index
    %c0_2 = arith.constant 0 : index
    %1 = vector.load %arg2[%c0_1, %c0_2] : memref<221x2xf32, #tpu.memory_space<vmem>>, vector<221x2xf32>
    %cst = arith.constant dense<0.000000e+00> : vector<16x2xf32>
    %2 = tpu.matmul %0, %1, %cst {dimension_numbers = #tpu.dot_dimension_numbers<[1], [0], [0], [1], [0, 0, 1, 1], [], []>} : vector<16x221xf32>, vector<221x2xf32>, vector<16x2xf32> -> vector<16x2xf32>
    %c0_3 = arith.constant 0 : index
    %c0_4 = arith.constant 0 : index
    %3 = vector.load %arg3[%c0_3, %c0_4] : memref<16x2xf32, #tpu.memory_space<vmem>>, vector<16x2xf32>
    tpu.vector_store %arg3[%c0_3, %c0_4], %2 {strides = array<i32>} : memref<16x2xf32, #tpu.memory_space<vmem>>, vector<16x2xf32>,
    return
  }
  func.func @transform_0(%arg0: i32) -> (i32, i32) {
    %c0_i32 = arith.constant 0 : i32
    %c0_i32_0 = arith.constant 0 : i32
    return %arg0, %c0_i32 : i32, i32
  }
  func.func @transform_1(%arg0: i32) -> (i32, i32) {
    %c0_i32 = arith.constant 0 : i32
    %c0_i32_0 = arith.constant 0 : i32
    %c0_i32_1 = arith.constant 0 : i32
    return %c0_i32, %c0_i32_0 : i32, i32
  }
  func.func @transform_2(%arg0: i32) -> (i32, i32) {
    %c0_i32 = arith.constant 0 : i32
    %c0_i32_0 = arith.constant 0 : i32
    return %arg0, %c0_i32 : i32, i32
  }
}

</mosaic_0001>

<bundles_post_ra>
// kernel: tpu_custom_call.1
= control target key start
LH: loop header
LB: loop body
LE: loop exit
PB: predicated region body
PF: predicated region fallthrough
CT: control target
= control target key end

     0   :  { %s724_s9 = smov 0   ;;  %s726_s10 = smov 0   ;;  %s893_s0 = inlined_call_operand.vmem [shape: f32[40,221], index: 0, kind: input, shape index: {}]   ;;  %s894_s1 = inlined_call_operand.vmem [shape: f32[221,2], index: 1, kind: input, shape index: {}]   ;;  %s895_s2 = inlined_call_operand.vmem [shape: f32[40,2], index: 2, kind: output, shape index: {}]  }
   0x1   :  { %s728_s11 = smov 0  }
   0x2 LB: > { %s737_s12 = sadd.s32 4294967295, %s675_s11   ;;  %s739_s13 = sadd.s32 1, %s675_s11   ;;  %s675_s11 = sphi %s728_s11, %s899_s11   ;;  %s671_s10 = sphi %s726_s10, %s898_s10   ;;  %s667_s9 = sphi %s724_s9, %s897_s9  }
   0x3   : > { %s63_s14 = ssub.s32 %s675_s11, %s739_s13  ;;  %s66_s15 = sadd.s32 1, %s671_s10 }
   0x4   : > { %p64_p0 = scmp.eq.s32.totalorder %s63_s14, 0  ;;  %p76_p1 = scmp.ne.s32.totalorder %s671_s10, %s667_s9 }
   0x5   : > { %p77_p2 = scmp.eq.s32.totalorder %s737_s12, 2  ;;  %p488_p3 = scmp.ge.s32.totalorder %s675_s11, 1 }
   0x6   : > { %s747_s16 = scalar_select %p64_p0, %s671_s10, %s66_s15  }
   0x7   : > { %p749_p4 = por %p77_p2, %p76_p1  ;;  %p124_p5 = scmp.lt.s32.totalorder %s675_s11, 4 }
   0x9   : > { %p125_p6 = pnand %p488_p3, %p124_p5 }
   0xa   : > { %s781_s8 = sshll.u32 (!%p125_p6), %s737_s12, 1  ;;  %s148_s14 = sand.u32 (!%p125_p6), 1, %s667_s9  }
   0xb   : > { %128 = sbr.rel (%p125_p6) target bundleno = 222 (0xde), region = 28  ;;  %p157_p7 = scmp.lt.s32.totalorder (!%p125_p6), %s781_s8, 4 }
  0x10   : > { %v192_v0 = vld [vmem:[%s894_s1 + $0x78] sm:$0xff]  ;;  %v191_v1 = vld [vmem:[%s894_s1 + $0x70] sm:$0xff]  ;;  %vm212_vm0 = vcmask 1044480   ;;  %v190_v3 = vld [vmem:[%s894_s1 + $0x68] sm:$0xff]  ;;  %s158_s29 = scalar_select %p157_p7, %s781_s8, 4  ;;  %vm205_vm1 = vcmask 760832  }
  0x11   : > { %216 = vmatpush.msra.mxu0 %v192_v0  ;;  %517 = vmatpush.msra.mxu2 %v192_v0  ;;  %v204_v2 = vld [vmem:[%s894_s1 + $0xd8] sm:$0x1f]  ;;  %v203_v4 = vld [vmem:[%s894_s1 + $0xd0] sm:$0xff]  ;;  %v202_v5 = vld [vmem:[%s894_s1 + $0xc8] sm:$0xff]  ;;  %vm262_vm2 = vcmask 15360   ;;  %s273_s19 = ssub.s32 (%p749_p4), 5, %s781_s8 }
  0x12   : > { %493 = vmatpush.msk.msra.mxu1 %vm212_vm0, %v204_v2  ;;  %v189_v6 = vld [vmem:[%s894_s1 + $0x60] sm:$0xff]  ;;  %v188_v8 = vld [vmem:[%s894_s1 + $0x58] sm:$0xff]  ;;  %v187_v10 = vld [vmem:[%s894_s1 + $0x50] sm:$0xff]  ;;  %s513_s15 = sshll.u32 %s158_s29, 4  ;;  %s514_s9 = sshll.u32 (%p749_p4), %s737_s12, 4 }
  0x13   : > { %217 = vmatpush.msra.mxu0 %v191_v1  ;;  %518 = vmatpush.msra.mxu2 %v191_v1  ;;  %v201_v7 = vld [vmem:[%s894_s1 + $0xc0] sm:$0xff]  ;;  %v200_v9 = vld [vmem:[%s894_s1 + $0xb8] sm:$0xff]  ;;  %v199_v11 = vld [vmem:[%s894_s1 + $0xb0] sm:$0xff]  ;;  %s161_s26 = scalar_lea.vmem %s893_s0, %s513_s15  ;;  %s489_s15 = sshll.u32 %s148_s14, 4 }
  0x14   : > { %244 = vmatpush.msra.mxu1 %v203_v4  ;;  %v186_v12 = vld [vmem:[%s894_s1 + $0x48] sm:$0xff]  ;;  %v185_v14 = vld [vmem:[%s894_s1 + $0x40] sm:$0xff]  ;;  %v184_v16 = vld [vmem:[%s894_s1 + $0x38] sm:$0xff]  ;;  %s848_s18 = scalar_lea.vmem [#allocation2], %s489_s15   ;;  %p274_p8 = scmp.lt.s32.totalorder (%p749_p4), %s273_s19, 2 }
  0x15   : > { %218 = vmatpush.msra.mxu0 %v190_v3  ;;  %519 = vmatpush.msra.mxu2 %v190_v3  ;;  %v198_v13 = vld [vmem:[%s894_s1 + $0xa8] sm:$0xff]  ;;  %v197_v15 = vld [vmem:[%s894_s1 + $0xa0] sm:$0xff]  ;;  %v196_v17 = vld [vmem:[%s894_s1 + $0x98] sm:$0xff]  ;;  %s859_s22 = scalar_lea.vmem (%p749_p4), %s895_s2, %s514_s9  }
  0x16   : > { %245 = vmatpush.msra.mxu1 %v202_v5  ;;  %v183_v18 = vld [vmem:[%s894_s1 + $0x30] sm:$0xff]  ;;  %v182_v20 = vld [vmem:[%s894_s1 + $0x28] sm:$0xff]  ;;  %v181_v22 = vld [vmem:[%s894_s1 + $0x20] sm:$0xff] }
  0x17   : > { %219 = vmatpush.msra.mxu0 %v189_v6  ;;  %520 = vmatpush.msra.mxu2 %v189_v6  ;;  %v195_v19 = vld [vmem:[%s894_s1 + $0x90] sm:$0xff]  ;;  %v194_v21 = vld [vmem:[%s894_s1 + $0x88] sm:$0xff]  ;;  %v193_v23 = vld [vmem:[%s894_s1 + $0x80] sm:$0xff] }
  0x18   : > { %246 = vmatpush.msra.mxu1 %v201_v7  ;;  %v180_v24 = vld [vmem:[%s894_s1 + $0x18] sm:$0xff]  ;;  %v174_v25 = vld [vmem:[%s161_s26 + $0x8] sm:$0xff]  ;;  %v179_v26 = vld [vmem:[%s894_s1 + $0x10] sm:$0xff] }
  0x19   : > { %220 = vmatpush.msra.mxu0 %v188_v8  ;;  %521 = vmatpush.msra.mxu2 %v188_v8  ;;  %v178_v27 = vld [vmem:[%s894_s1 + $0x8] sm:$0xff]  ;;  %v177_v28 = vld [vmem:[%s894_s1] sm:$0xff]  ;;  %v175_v30 = vld [vmem:[%s161_s26 + $0x10] sm:$0xff] }
  0x1a   : > { %247 = vmatpush.msra.mxu1 %v200_v9  ;;  %v173_v29 = vld [vmem:[%s161_s26] sm:$0xff]  ;;  %v176_v31 = vld [vmem:[%s161_s26 + $0x18] sm:$0xff] }
  0x1b   : > { %221 = vmatpush.msra.mxu0 %v187_v10  ;;  %522 = vmatpush.msra.mxu2 %v187_v10 }
  0x1c   : > { %248 = vmatpush.msra.mxu1 %v199_v11 }
  0x1d   : > { %222 = vmatpush.msra.mxu0 %v186_v12  ;;  %523 = vmatpush.msra.mxu2 %v186_v12 }
  0x1e   : > { %249 = vmatpush.msra.mxu1 %v198_v13 }
  0x1f   : > { %223 = vmatpush.msra.mxu0 %v185_v14  ;;  %524 = vmatpush.msra.mxu2 %v185_v14 }
  0x20   : > { %250 = vmatpush.msra.mxu1 %v197_v15 }
  0x21   : > { %224 = vmatpush.msra.mxu0 %v184_v16  ;;  %525 = vmatpush.msra.mxu2 %v184_v16 }
  0x22   : > { %251 = vmatpush.msra.mxu1 %v196_v17 }
  0x23   : > { %225 = vmatpush.msra.mxu0 %v183_v18  ;;  %526 = vmatpush.msra.mxu2 %v183_v18 }
  0x24   : > { %252 = vmatpush.msra.mxu1 %v195_v19 }
  0x25   : > { %226 = vmatpush.msra.mxu0 %v182_v20  ;;  %527 = vmatpush.msra.mxu2 %v182_v20 }
  0x26   : > { %253 = vmatpush.msra.mxu1 %v194_v21 }
  0x27   : > { %227 = vmatpush.msra.mxu0 %v181_v22  ;;  %528 = vmatpush.msra.mxu2 %v181_v22 }
  0x28   : > { %254 = vmatpush.msra.mxu1 %v193_v23 }
  0x29   : > { %228 = vmatpush.msra.mxu0 %v180_v24  ;;  %529 = vmatpush.msra.mxu2 %v180_v24 }
  0x2a   : > { %494 = vmatmul.msk.f32.vlgmr.msra.gmra.mxu1 %vm205_vm1, %v174_v25 }
  0x2b   : > { %229 = vmatpush.msra.mxu0 %v179_v26  ;;  %530 = vmatpush.msra.mxu2 %v179_v26 }
  0x2d   : > { %230 = vmatpush.msra.mxu0 %v178_v27  ;;  %531 = vmatpush.msra.mxu2 %v178_v27 }
  0x2f   : > { %231 = vmatpush.msra.mxu0 %v177_v28  ;;  %532 = vmatpush.msra.mxu2 %v177_v28 }
  0x30   : > { %232 = vmatmul.f32.vlgmr.msra.gmra.mxu0 %v173_v29  ;;  %235 = vmatmul.f32.vlgmr.msra.gmra.mxu2 %v175_v30 }
  0x32   : > { %495 = vmatmul.msk.f32.gmra.mxu1 %vm205_vm1, %v176_v31 }
  0xa7   : > { %v256_v32 = vpop.f32.mrf.mxu1 }
  0xad   : > { %v233_v33 = vpop.f32.mrf.mxu0 }
  0xae   : > { %v257_v34 = vadd.f32 %v256_v32, %v233_v33 }
  0xaf   : > { %v259_v35 = vpop.f32.mrf.mxu1 }
  0xb0   : > { %263 = vst.msk [vmem:[%s848_s18] sm:$0xff] %vm262_vm2, %v257_v34 }
  0xb2   : > { %271 = sbr.rel (!%p749_p4) target bundleno = 222 (0xde), region = 32 }
  0xb3   : > { %v236_v36 = vpop.f32.mrf.mxu2 }
  0xb4   : > { %v260_v37 = vadd.f32 %v259_v35, %v236_v36 }
  0xb6   : > { %264 = vst.msk [vmem:[%s848_s18 + $0x8] sm:$0xff] %vm262_vm2, %v260_v37 }
  0xb7   : > { %s901_s19 = smov (!%p274_p8, %s273_s19), 2 }
  0xb8   : > { %s498_s23 = sshll.u32 %s901_s19, 3 }
  0xb9   : > { %p501_p9 = scmp.eq.s32.totalorder %s498_s23, 0 }
  0xba   : > { %s865_s24 = sshrl.u32 (!%p501_p9), %s901_s19, 1 }
  0xbb   : > { %282 = sbr.rel (%p501_p9) target bundleno = 222 (0xde), region = 36  ;;  %p502_p10 = scmp.le.s32.totalorder (!%p501_p9), %s865_s24, 0 }
  0xc0   : > { %441 = sbr.rel (%p502_p10) target bundleno = 205 (0xcd), region = 112  ;;  %s677_s12 = smov (!%p502_p10), %s859_s22  }
  0xc1   : > { %s681_s17 = smov (!%p502_p10), %s848_s18   ;;  %s685_s8 = smov (!%p502_p10), 0  }
  0xc2   : > { %s689_s25 = smov (!%p502_p10), 0  }
  0xc5 LB: >> { %v347_v38 = vld [vmem:[%s683_s17] sm:$0xff]  ;;  %v349_v39 = vld [vmem:[%s683_s17 + $0x8] sm:$0xff]  ;;  %s351_s26 = sadd.s32 1, %s687_s8  ;;  %s341_s25 = sadd.s32 1, %s691_s25   ;;  %s691_s25 = sphi %s689_s25, %s341_s25   ;;  %s687_s8 = sphi %s685_s8, %s686_s8   ;;  %s683_s17 = sphi %s681_s17, %s356_s17   ;;  %s679_s12 = sphi %s677_s12, %s357_s12  }
  0xc6   : >> { %348 = vst [vmem:[%s679_s12] sm:$0xff] %v347_v38  ;;  %p352_p11 = scmp.ge.s32.totalorder %s351_s26, %s865_s24  ;;  %p340_p12 = scmp.ge.s32.totalorder %s341_s25, %s865_s24 }
  0xc7   : >> { %350 = vst [vmem:[%s679_s12 + $0x8] sm:$0xff] %v349_v39 }
  0xc8   : >> { %s903_s26 = smov (%p352_p11, %s351_s26), 0  ;;  %343 = sbr.rel (!%p340_p12) target bundleno = 197 (0xc5), region = 118 }
  0xc9   : >> { %s503_s27 = sshll.u32 %s903_s26, 4  ;;  %s686_s8 = smov %s903_s26  }
  0xca   : >> { %s356_s17 = scalar_lea.vmem %s848_s18, %s503_s27 [#allocation2]   ;;  %s357_s12 = scalar_lea.vmem %s859_s22, %s503_s27  }
  0xcd PF: > { %s875_s28 = sand.u32 1, %s901_s19   ;;  %s515_s29 = sshll.u32 %s865_s24, 4 }
  0xce   : > { %s362_s30 = scalar_lea.vmem %s848_s18, %s515_s29 [#allocation2]   ;;  %s364_s3 = scalar_lea.vmem %s859_s22, %s515_s29  }
  0xcf   : > { %p508_p13 = scmp.le.s32.totalorder %s875_s28, 0 }
  0xd0   : > { %s693_s4 = smov (!%p508_p13), %s364_s3   ;;  %s697_s5 = smov (!%p508_p13), %s362_s30  }
  0xd1   : > { %455 = sbr.rel (%p508_p13) target bundleno = 222 (0xde), region = 123  ;;  %s701_s6 = smov (!%p508_p13), 0  }
  0xd2   : > { %s705_s7 = smov (!%p508_p13), 0  }
  0xd6 LB: >> { %v374_v40 = vld [vmem:[%s699_s5] sm:$0xff]  ;;  %s376_s11 = sadd.s32 1, %s703_s6  ;;  %s368_s7 = sadd.s32 1, %s707_s7   ;;  %s707_s7 = sphi %s705_s7, %s368_s7   ;;  %s703_s6 = sphi %s701_s6, %s702_s6   ;;  %s699_s5 = sphi %s697_s5, %s381_s5   ;;  %s695_s4 = sphi %s693_s4, %s382_s4  }
  0xd7   : >> { %375 = vst [vmem:[%s695_s4] sm:$0xff] %v374_v40  ;;  %p377_p0 = scmp.ge.s32.totalorder %s376_s11, %s875_s28  ;;  %p367_p1 = scmp.ge.s32.totalorder %s368_s7, %s875_s28 }
  0xd9   : >> { %s905_s11 = smov (%p377_p0, %s376_s11), 0  ;;  %370 = sbr.rel (!%p367_p1) target bundleno = 214 (0xd6), region = 129 }
  0xda   : >> { %s509_s14 = sshll.u32 %s905_s11, 3  ;;  %s702_s6 = smov %s905_s11  }
  0xdb   : >> { %s381_s5 = scalar_lea.vmem %s362_s30, %s509_s14 [#allocation2]   ;;  %s382_s4 = scalar_lea.vmem %s364_s3, %s509_s14  }
  0xde PF: > { %p9_p2 = scmp.ge.s32.totalorder %s739_s13, 5   ;;  %s897_s9 = smov %s671_s10 }
  0xdf   : > { %s898_s10 = smov %s747_s16  ;;  %s899_s11 = smov %s739_s13 }
  0xe0   :  { %11 = sbr.rel (!%p9_p2) target bundleno = 2 (0x2), region = 140 }

</bundles_post_ra>
